<compile_context>
chip_gen: v5e
topology: v5e:2x2
jax: 0.10.0
libtpu: 0.0.40
codegen_flags: <defaults>
</compile_context>

<pallas_src>
from functools import partial
from typing import NamedTuple

import numpy as np

import jax
import jax.numpy as jnp
from jax.experimental import pallas as pl
from jax.experimental.pallas import tpu as pltpu


def _round_up(x, m):
    return (x + m - 1) // m * m


class PreparedLogitsWeights(NamedTuple):
    w_kn: jax.Array      # (K, Np)    base embedding, K-major, vocab padded to tn multiple
    dw_kn: jax.Array     # (D, K, Np) stacked delta weights, K-major, vocab padded
    vocab_size: int      # original (unpadded) vocab size of this rank
    tn: int              # vocab tile used for padding


def prepare_logits_delta_weights(embedding, delta_w, *, tn=512):
    """One-time (weight-load-time) layout transform: pad vocab + transpose to K-major."""
    N, K = embedding.shape
    D, N2, K2 = delta_w.shape
    assert N2 == N and K2 == K
    tn = min(tn, _round_up(N, 128))
    Np = _round_up(N, tn)
    emb_p = jnp.pad(embedding, ((0, Np - N), (0, 0))) if Np != N else embedding
    dw_p = jnp.pad(delta_w, ((0, 0), (0, Np - N), (0, 0))) if Np != N else delta_w
    w_kn = jnp.asarray(jnp.swapaxes(emb_p, 0, 1))     # (K, Np)
    dw_kn = jnp.asarray(jnp.swapaxes(dw_p, 1, 2))     # (D, K, Np)
    return PreparedLogitsWeights(w_kn=w_kn, dw_kn=dw_kn, vocab_size=N, tn=tn)


def _logits_delta_kernel(act_ref, cnt_ref, idx_ref, x_ref, w_ref, dw_ref, o_ref, acc_ref,
                         *, scale):
    # act_ref : (n_active,)            int32 SMEM  compacted active delta slot ids
    # cnt_ref : (n_tiles * n_active,)  int32 SMEM  tokens-in-tile-using-slot counts (flat)
    # idx_ref : (tm, 1)   int32  per-token delta slot (-1 == no delta)
    # x_ref   : (tm, K)   bf16   activations (hidden states)
    # w_ref   : (K, tn)   bf16   base embedding tile, K-major
    # dw_ref  : (1, K, tn) bf16  delta weight tile for active slot act_ref[d], K-major
    # o_ref   : (tm, tn)  f32    logits tile
    # acc_ref : (tm, tn)  f32    VMEM accumulator scratch
    i = pl.program_id(1)           # token-tile index
    d = pl.program_id(2)           # active-delta step (reduction axis)
    nd = pl.num_programs(2)
    x = x_ref[...]                 # bf16, shared by base and delta matmuls

    @pl.when(d == 0)
    def _():                       # base logits: bf16 x bf16 -> f32 accumulate on the MXU
        acc_ref[...] = jnp.dot(x, w_ref[...], preferred_element_type=jnp.float32)

    @pl.when(cnt_ref[i * nd + d] > 0)   # skip MXU/VPU work when no token here uses this slot
    def _():
        yd = jnp.dot(x, dw_ref[0], preferred_element_type=jnp.float32)
        sel = (idx_ref[...] == act_ref[d]).astype(jnp.float32)   # (tm, 1) 0/1 selector
        acc_ref[...] += yd * sel

    @pl.when(d == nd - 1)
    def _():
        out = acc_ref[...]
        if scale != 1.0:           # base_layer.scale (compile-time constant)
            out = out * scale
        o_ref[...] = out.astype(o_ref.dtype)


def logits_processor_with_delta(hidden_states, prepared: PreparedLogitsWeights, indices,
                                *, logit_scale=1.0, tm=128):
    """Logits like LogitsProcessorWithDelta._get_logits (tp_size == 1). Returns f32."""
    M, K = hidden_states.shape
    Kw, Np = prepared.w_kn.shape
    D, Kd, Np2 = prepared.dw_kn.shape
    assert Kw == K and Kd == K and Np2 == Np
    N = prepared.vocab_size
    tn = prepared.tn

    # bf16 packs 2 rows per sublane -> keep token tiles a multiple of 16.
    tm = min(tm, _round_up(M, 16))
    Mp = _round_up(M, tm)

    # --- host-side compaction of active delta slots (drives DMA skipping) ---------------
    idx_np = np.asarray(jax.device_get(indices)).astype(np.int32).reshape(M)
    assert idx_np.max(initial=-1) < D, "delta index out of range (>= max_deltas)"
    active = np.unique(idx_np[idx_np >= 0]).astype(np.int32)
    if active.size == 0:
        active = np.zeros((1,), np.int32)      # nothing active: one dummy slot, compute skipped
    n_active = int(active.size)

    idx_pad = np.full((Mp,), -1, np.int32)
    idx_pad[:M] = idx_np
    tiles = idx_pad.reshape(Mp // tm, tm)
    counts = (tiles[:, :, None] == active[None, None, :]).sum(axis=1).astype(np.int32)
    counts_flat = counts.reshape(-1)           # (n_tiles * n_active,) -> 1D SMEM (no padding blowup)

    x_p = jnp.pad(hidden_states, ((0, Mp - M), (0, 0))) if Mp != M else hidden_states
    idx2d = jnp.asarray(idx_pad).reshape(Mp, 1)

    grid = (Np // tn, Mp // tm, n_active)      # vocab OUTER (megacore), tokens, active deltas

    # --- VMEM / cost budgeting -----------------------------------------------------------
    eltw = jnp.dtype(prepared.w_kn.dtype).itemsize
    eltx = jnp.dtype(hidden_states.dtype).itemsize
    est = 2 * (tm * 4 + tm * K * eltx + K * tn * eltw + K * tn * eltw + tm * tn * 4) \
        + tm * tn * 4
    try:
        vmem_cap = int(getattr(pltpu.get_tpu_info(), "vmem_capacity_bytes",
                               64 * 1024 * 1024))
    except Exception:
        vmem_cap = 64 * 1024 * 1024
    vmem_limit = int(min(max(est * 5 // 4, 32 * 1024 * 1024), vmem_cap * 3 // 4))

    n_delta_tokens = int((idx_np >= 0).sum())
    cost = pl.CostEstimate(
        flops=int(2 * M * K * N + 2 * n_delta_tokens * K * N),
        transcendentals=0,
        bytes_accessed=int((K * Np + (Mp // tm) * n_active * K * Np) * eltw
                           + (Np // tn) * Mp * K * eltx + Mp * Np * 4),
    )

    out = pl.pallas_call(
        partial(_logits_delta_kernel, scale=float(logit_scale)),
        out_shape=jax.ShapeDtypeStruct((Mp, Np), jnp.float32),
        grid_spec=pltpu.PrefetchScalarGridSpec(
            num_scalar_prefetch=2,
            grid=grid,
            in_specs=[
                pl.BlockSpec((tm, 1), lambda j, i, d, act, cnt: (i, 0)),       # delta slot/token
                pl.BlockSpec((tm, K), lambda j, i, d, act, cnt: (i, 0)),       # activations
                pl.BlockSpec((K, tn), lambda j, i, d, act, cnt: (0, j)),       # base emb (K-major)
                pl.BlockSpec((1, K, tn),
                             lambda j, i, d, act, cnt: (act[d], 0, j)),        # active delta only
            ],
            out_specs=pl.BlockSpec((tm, tn), lambda j, i, d, act, cnt: (i, j)),
            scratch_shapes=[pltpu.VMEM((tm, tn), jnp.float32)],
        ),
        compiler_params=pltpu.CompilerParams(
            dimension_semantics=("parallel", "arbitrary", "arbitrary"),
            vmem_limit_bytes=vmem_limit),
        cost_estimate=cost,
    )(jnp.asarray(active), jnp.asarray(counts_flat), idx2d, x_p, prepared.w_kn, prepared.dw_kn)

    # tp_size == 1 -> tensor_model_parallel_gather is identity; slice away padding.
    return out[:M, :N]


if __name__ == "__main__":
    key = jax.random.PRNGKey(0)
    M, K, N, D = 8, 256, 512, 4   # tokens, hidden_size, vocab_size (per rank), max_deltas
    k1, k2, k3 = jax.random.split(key, 3)

    x = jax.random.normal(k1, (M, K), dtype=jnp.float32).astype(jnp.bfloat16)
    embedding = (jax.random.normal(k2, (N, K), dtype=jnp.float32) * 0.05).astype(jnp.bfloat16)
    # Uncompressed stacked delta weights (self.weight_stacked).
    delta_w = (jax.random.normal(k3, (D, N, K), dtype=jnp.float32) * 0.05).astype(jnp.bfloat16)
    # Per-token delta slot; -1 means "no delta applied". Slots 1 and 3 are never used
    # (and therefore never streamed by the kernel).
    indices = jnp.array([-1, 0, 2, 2, -1, 0, 0, 2], dtype=jnp.int32)

    prepared = prepare_logits_delta_weights(embedding, delta_w)   # one-time weight transform
    logits = logits_processor_with_delta(x, prepared, indices, logit_scale=1.0)
    logits = jax.block_until_ready(logits)

    # Plain-JAX f32 reference.
    xf = x.astype(jnp.float32)
    ref = xf @ embedding.astype(jnp.float32).T
    for d in range(D):
        yd = xf @ delta_w[d].astype(jnp.float32).T
        ref = ref + jnp.where(indices[:, None] == d, yd, 0.0)

    assert logits.shape == (M, N)
    assert logits.dtype == jnp.float32
    assert jnp.allclose(logits, ref, atol=5e-2, rtol=5e-2), "mismatch"

    print("KERNEL_OK")
</pallas_src>

<mosaic_0001>
module attributes {stable_mosaic.version = 11 : i64} {
  func.func @_logits_delta_kernel(%arg0: i32, %arg1: i32, %arg2: i32, %arg3: memref<2xi32, #tpu.memory_space<smem>>, %arg4: memref<2xi32, #tpu.memory_space<smem>>, %arg5: memref<16x1xi32, #tpu.memory_space<vmem>>, %arg6: memref<16x256xbf16, #tpu.memory_space<vmem>>, %arg7: memref<256x512xbf16, #tpu.memory_space<vmem>>, %arg8: memref<1x256x512xbf16, #tpu.memory_space<vmem>>, %arg9: memref<16x512xf32, #tpu.memory_space<vmem>>, %arg10: memref<16x512xf32, #tpu.memory_space<vmem>>) attributes {dimension_semantics = [#tpu.dimension_semantics<parallel>, #tpu.dimension_semantics<arbitrary>, #tpu.dimension_semantics<arbitrary>], iteration_bounds = array<i64: 1, 1, 2>, scalar_prefetch = 2 : i64, scratch_operands = 1 : i64, tpu.core_type = #tpu.core_type<tc>, window_params = [{transform_indices = @transform_0, window_bounds = array<i64: 16, 1>}, {transform_indices = @transform_1, window_bounds = array<i64: 16, 256>}, {transform_indices = @transform_2, window_bounds = array<i64: 256, 512>}, {transform_indices = @transform_3, window_bounds = array<i64: 1, 256, 512>}, {transform_indices = @transform_4, window_bounds = array<i64: 16, 512>}]} {
    %c0 = arith.constant 0 : index
    %c0_0 = arith.constant 0 : index
    %0 = vector.load %arg6[%c0, %c0_0] : memref<16x256xbf16, #tpu.memory_space<vmem>>, vector<16x256xbf16>
    %c0_i32 = arith.constant 0 : i32
    %1 = arith.cmpi eq, %arg2, %c0_i32 : i32
    %2 = arith.extui %1 : i1 to i32
    %c0_i32_1 = arith.constant 0 : i32
    %3 = arith.cmpi ne, %2, %c0_i32_1 : i32
    scf.if %3 {
      %c0_5 = arith.constant 0 : index
      %c0_6 = arith.constant 0 : index
      %14 = vector.load %arg7[%c0_5, %c0_6] : memref<256x512xbf16, #tpu.memory_space<vmem>>, vector<256x512xbf16>
      %cst = arith.constant dense<0.000000e+00> : vector<16x512xf32>
      %15 = tpu.matmul %0, %14, %cst {dimension_numbers = #tpu.dot_dimension_numbers<[1], [0], [0], [1], [0, 0, 1, 1], [], []>} : vector<16x256xbf16>, vector<256x512xbf16>, vector<16x512xf32> -> vector<16x512xf32>
      %c0_7 = arith.constant 0 : index
      %c0_8 = arith.constant 0 : index
      %16 = vector.load %arg10[%c0_7, %c0_8] : memref<16x512xf32, #tpu.memory_space<vmem>>, vector<16x512xf32>
      tpu.vector_store %arg10[%c0_7, %c0_8], %15 {strides = array<i32>} : memref<16x512xf32, #tpu.memory_space<vmem>>, vector<16x512xf32>,
    } else {
    }
    %c2_i32 = arith.constant 2 : i32
    %4 = arith.muli %arg1, %c2_i32 : i32
    %5 = arith.addi %4, %arg2 : i32
    %6 = arith.index_cast %5 : i32 to index
    %7 = memref.load %arg4[%6] : memref<2xi32, #tpu.memory_space<smem>>
    %c0_i32_2 = arith.constant 0 : i32
    %8 = arith.cmpi sgt, %7, %c0_i32_2 : i32
    %9 = arith.extui %8 : i1 to i32
    %c0_i32_3 = arith.constant 0 : i32
    %10 = arith.cmpi ne, %9, %c0_i32_3 : i32
    scf.if %10 {
      %c0_5 = arith.constant 0 : index
      %c0_6 = arith.constant 0 : index
      %c0_7 = arith.constant 0 : index
      %14 = vector.load %arg8[%c0_5, %c0_6, %c0_7] : memref<1x256x512xbf16, #tpu.memory_space<vmem>>, vector<1x256x512xbf16>
      %15 = vector.shape_cast %14 : vector<1x256x512xbf16> to vector<256x512xbf16>
      %cst = arith.constant dense<0.000000e+00> : vector<16x512xf32>
      %16 = tpu.matmul %0, %15, %cst {dimension_numbers = #tpu.dot_dimension_numbers<[1], [0], [0], [1], [0, 0, 1, 1], [], []>} : vector<16x256xbf16>, vector<256x512xbf16>, vector<16x512xf32> -> vector<16x512xf32>
      %c0_8 = arith.constant 0 : index
      %c0_9 = arith.constant 0 : index
      %17 = vector.load %arg5[%c0_8, %c0_9] : memref<16x1xi32, #tpu.memory_space<vmem>>, vector<16x1xi32>
      %18 = arith.index_cast %arg2 : i32 to index
      %19 = memref.load %arg3[%18] : memref<2xi32, #tpu.memory_space<smem>>
      %20 = vector.broadcast %19 : i32 to vector<16x1xi32>
      %21 = arith.cmpi eq, %17, %20 : vector<16x1xi32>
      %22 = arith.extui %21 : vector<16x1xi1> to vector<16x1xi32>
      %23 = arith.sitofp %22 : vector<16x1xi32> to vector<16x1xf32>
      %c0_10 = arith.constant 0 : index
      %c0_11 = arith.constant 0 : index
      %24 = vector.load %arg10[%c0_10, %c0_11] : memref<16x512xf32, #tpu.memory_space<vmem>>, vector<16x512xf32>
      %25 = vector.broadcast %23 : vector<16x1xf32> to vector<16x512xf32>
      %26 = arith.mulf %16, %25 : vector<16x512xf32>
      %27 = arith.addf %24, %26 : vector<16x512xf32>
      %c0_12 = arith.constant 0 : index
      %c0_13 = arith.constant 0 : index
      %28 = vector.load %arg10[%c0_12, %c0_13] : memref<16x512xf32, #tpu.memory_space<vmem>>, vector<16x512xf32>
      tpu.vector_store %arg10[%c0_12, %c0_13], %27 {strides = array<i32>} : memref<16x512xf32, #tpu.memory_space<vmem>>, vector<16x512xf32>,
    } else {
    }
    %c1_i32 = arith.constant 1 : i32
    %11 = arith.cmpi eq, %arg2, %c1_i32 : i32
    %12 = arith.extui %11 : i1 to i32
    %c0_i32_4 = arith.constant 0 : i32
    %13 = arith.cmpi ne, %12, %c0_i32_4 : i32
    scf.if %13 {
      %c0_5 = arith.constant 0 : index
      %c0_6 = arith.constant 0 : index
      %14 = vector.load %arg10[%c0_5, %c0_6] : memref<16x512xf32, #tpu.memory_space<vmem>>, vector<16x512xf32>
      %c0_7 = arith.constant 0 : index
      %c0_8 = arith.constant 0 : index
      %15 = vector.load %arg9[%c0_7, %c0_8] : memref<16x512xf32, #tpu.memory_space<vmem>>, vector<16x512xf32>
      tpu.vector_store %arg9[%c0_7, %c0_8], %14 {strides = array<i32>} : memref<16x512xf32, #tpu.memory_space<vmem>>, vector<16x512xf32>,
    } else {
    }
    return
  }
  func.func @transform_0(%arg0: i32, %arg1: i32, %arg2: i32, %arg3: memref<2xi32, #tpu.memory_space<smem>>, %arg4: memref<2xi32, #tpu.memory_space<smem>>) -> (i32, i32) {
    %c0_i32 = arith.constant 0 : i32
    %c0_i32_0 = arith.constant 0 : i32
    return %arg1, %c0_i32 : i32, i32
  }
  func.func @transform_1(%arg0: i32, %arg1: i32, %arg2: i32, %arg3: memref<2xi32, #tpu.memory_space<smem>>, %arg4: memref<2xi32, #tpu.memory_space<smem>>) -> (i32, i32) {
    %c0_i32 = arith.constant 0 : i32
    %c0_i32_0 = arith.constant 0 : i32
    return %arg1, %c0_i32 : i32, i32
  }
  func.func @transform_2(%arg0: i32, %arg1: i32, %arg2: i32, %arg3: memref<2xi32, #tpu.memory_space<smem>>, %arg4: memref<2xi32, #tpu.memory_space<smem>>) -> (i32, i32) {
    %c0_i32 = arith.constant 0 : i32
    %c0_i32_0 = arith.constant 0 : i32
    return %c0_i32, %arg0 : i32, i32
  }
  func.func @transform_3(%arg0: i32, %arg1: i32, %arg2: i32, %arg3: memref<2xi32, #tpu.memory_space<smem>>, %arg4: memref<2xi32, #tpu.memory_space<smem>>) -> (i32, i32, i32) {
    %0 = arith.index_cast %arg2 : i32 to index
    %1 = memref.load %arg3[%0] : memref<2xi32, #tpu.memory_space<smem>>
    %c0_i32 = arith.constant 0 : i32
    %c0_i32_0 = arith.constant 0 : i32
    return %1, %c0_i32, %arg0 : i32, i32, i32
  }
  func.func @transform_4(%arg0: i32, %arg1: i32, %arg2: i32, %arg3: memref<2xi32, #tpu.memory_space<smem>>, %arg4: memref<2xi32, #tpu.memory_space<smem>>) -> (i32, i32) {
    %c0_i32 = arith.constant 0 : i32
    return %arg1, %arg0 : i32, i32
  }
}

</mosaic_0001>

<bundles_post_ra>
// kernel: tpu_custom_call.1
= control target key start
LH: loop header
LB: loop body
LE: loop exit
PB: predicated region body
PF: predicated region fallthrough
CT: control target
= control target key end

     0   :  { %s2514_s27 = smov [#allocation4]   ;;  %s2515_s28 = smov [#allocation5]   ;;  %s2907_s0 = inlined_call_operand.vmem [shape: s32[2], index: 0, kind: input, shape index: {}]   ;;  %s2908_s2 = inlined_call_operand.vmem [shape: s32[16,1], index: 2, kind: input, shape index: {}]   ;;  %s2909_s3 = inlined_call_operand.vmem [shape: bf16[16,256], index: 3, kind: input, shape index: {}]   ;;  %s2910_s4 = inlined_call_operand.hbm [shape: bf16[256,512], index: 4, kind: input, shape index: {}]   ;;  %s2911_s5 = inlined_call_operand.hbm [shape: bf16[4,256,512], index: 5, kind: input, shape index: {}]   ;;  %s2912_s6 = inlined_call_operand.hbm [shape: f32[16,512], index: 6, kind: output, shape index: {}]   ;;  %s2913_s1 = inlined_call_operand.vmem [shape: s32[2], index: 1, kind: input, shape index: {}]  }
   0x1   :  { %2917 = sst [smem:[#allocation18_spill]] %s2910_s4  ;;  %s12_s23 = sshll.u32 %s2907_s0, 4  ;;  %s13_s23 = int_to_ptr.vmem [resolvable:$true] %s12_s23 }
   0x2   :  { %s17_s26 = sshll.u32 %s2913_s1, 4  ;;  %s18_s26 = int_to_ptr.vmem [resolvable:$true] %s17_s26 }
   0x3   :  { %15 = dma.vmem_to_smem %s13_s23, 16, %s2514_s27, [#allocation3] }
   0x4   :  { %20 = dma.vmem_to_smem %s18_s26, 16, %s2515_s28, [#allocation3] }
   0x5   :  { %2476 = dma.done.wait [#allocation3], 32 }
   0x6   :  { %2477 = vsyncadd [#allocation3], 4294967264 }
   0x7   :  { %23 = sfence }
   0x8   :  { %24 = vsyncpa [#allocation7], 0 }
   0x9   :  { %25 = vsyncpa [#allocation10], 0 }
   0xa   :  { %27 = vsyncpa [#allocation10 + $0x1], 0 }
   0xb   :  { %28 = vsyncpa [#allocation8], 0  ;;  %s2565_s29 = smov 0   ;;  %s2567_s0 = smov 0  }
   0xc   :  { %s2569_s30 = smov 0   ;;  %s2571_s1 = smov 0  }
   0xd   :  { %s2573_s7 = smov 0   ;;  %s2575_s8 = smov 0  }
   0xe LB: > { %s2914_s9 = sadd.s32 4294967295, %s2512_s8   ;;  %p155_p0 = scmp.ne.s32.totalorder %s2496_s0, %s2492_s29  ;;  %s2512_s8 = sphi %s2575_s8, %s34_s8   ;;  %s2508_s7 = sphi %s2573_s7, %s2930_s7   ;;  %s2504_s1 = sphi %s2571_s1, %s2929_s1   ;;  %s2500_s30 = sphi %s2569_s30, %s2928_s30   ;;  %s2496_s0 = sphi %s2567_s0, %s2927_s0   ;;  %s2492_s29 = sphi %s2565_s29, %s2926_s29  }
   0xf   : > { %p2597_p1 = scmp.eq.s32.totalorder %s2914_s9, 0  ;;  %p1568_p2 = scmp.ge.s32.totalorder %s2512_s8, 1 }
  0x10   : > { %p194_p3 = scmp.lt.s32.totalorder %s2512_s8, 3  ;;  %s2920_s4 = sld [smem:[#allocation18_spill]] }
  0x11   : > { %p2605_p4 = por %p2597_p1, %p155_p0  ;;  %s2516_s16 = smov [#allocation6]  }
  0x12   : > { %p2612_p5 = pnand %p1568_p2, %p194_p3  ;;  %s229_s17 = sshll.u32 %s2516_s16, 4  ;;  %s230_s17 = int_to_ptr.vmem [resolvable:$true] %s229_s17 }
  0x13   : > { %s2915_s18 = smov 256   ;;  %s2916_s19 = smov 16  }
  0x14   : > { %p2261_p6 = pneg %p2612_p5  ;;  %s46_s20 = sadd.s32 1, %s2508_s7 }
  0x15   : > { %p47_p8 = scmp.ge.s32.totalorder %s46_s20, 2  ;;  %s135_s21 = sld [smem:[#allocation4 + %s2508_s7]] }
  0x16   : > { %s227_s14 = sshll.u32 %s2920_s4, 4  ;;  %p2262_p7 = pnand %p2261_p6, %p2597_p1  ;;  %s228_s14 = int_to_ptr.hbm [resolvable:$true] %s227_s14 }
  0x17   : > { %p149_p9 = scmp.ne.s32.totalorder %s2500_s30, %s2496_s0  ;;  %s2932_s20 = smov (%p47_p8, %s46_s20), 0 }
  0x18   : > { %2264 = dma.hbm_to_vmem [thread:$0]  (!%p2262_p7), %s228_s14, 8192, %s230_s17, [#allocation7], %s2915_s18, %s2915_s18, %s2916_s19  }
  0x19   : > { %p150_p10 = scmp.eq.s32.totalorder %s2512_s8, 0  ;;  %s136_s22 = sld [smem:[#allocation4 + %s2932_s20]] }
  0x1a   : > { %s142_s23 = sadd.s32 1, %s2500_s30  ;;  %p2272_p12 = scmp.lt.s32.totalorder %s2512_s8, 2 }
  0x1b   : > { %p151_p11 = por %p150_p10, %p149_p9  ;;  %s243_s24 = sand.u32 1, %s2500_s30  }
  0x1c   : > { %s1573_s28 = sshll.u32 %s243_s24, 9 }
  0x1d   : > { %s2251_s25 = scalar_select %p151_p11, [#allocation4], [#allocation12] }
  0x1e   : > { %s2252_s26 = scalar_select %p151_p11, %s2508_s7, 0 }
  0x1f   : > { %s137_s27 = ssub.s32 %s135_s21, %s136_s22  ;;  %p2635_p0 = pnand %p2272_p12, %p151_p11 }
  0x20   : > { %p140_p13 = scmp.eq.s32.totalorder %s137_s27, 0  ;;  %s2934_s25 = smov (!%p2272_p12, %s2251_s25), [#allocation13] }
  0x21   : > { %s2936_s26 = smov (!%p2272_p12, %s2252_s26), 0  ;;  %s247_s14 = scalar_lea.vmem [#allocation9], %s1573_s28 }
  0x22   : > { %s2640_s12 = scalar_select %p140_p13, %s2500_s30, %s142_s23  }
  0x23   : > { %s248_s13 = sld [smem:[%s2934_s25 + %s2936_s26]]  ;;  %s258_s16 = sshll.u32 %s247_s14, 4  ;;  %s259_s16 = int_to_ptr.vmem [resolvable:$true] %s258_s16 }
  0x24   : > { %s244_s22 = scalar_lea.sflag [#allocation10], %s243_s24  ;;  %p2398_p3 = pneg %p2635_p0 }
  0x25   : > { %s2401_s26 = scalar_lea.hbm %s2911_s5, 2048 }
  0x29   : > { %s2116_s17 = sshll.u32 %s248_s13, 9 }
  0x2a   : > { %s255_s19 = scalar_lea.hbm %s2911_s5, %s2116_s17 }
  0x2b   : > { %s256_s21 = sshll.u32 %s255_s19, 4  ;;  %s257_s21 = int_to_ptr.hbm [resolvable:$true] %s256_s21 }
  0x2c   : > { %s2394_s27 = sshra.s32 %s257_s21, 4  ;;  %s2395_s27 = int_to_ptr.hbm [resolvable:$true] %s2394_s27 }
  0x2d   : > { %s2396_s4 = scalar_lea.hbm %s2395_s27, 512  ;;  %p2402_p8 = scmp.lt.s32.totalorder %s2395_s27, %s2911_s5 }
  0x2e   : > { %p2397_p2 = scmp.ne.s32.totalorder %s2395_s27, %s2396_s4  ;;  %p2403_p9 = scmp.lt.s32.totalorder %s2401_s26, %s2396_s4 }
  0x30   : > { %p2399_p6 = pnand %p2398_p3, %p2397_p2  ;;  %p2404_p10 = por %p2403_p9, %p2402_p8 }
  0x32   : > { %p2400_p7 = pneg %p2399_p6 }
  0x34   : > { %p2405_p11 = pnand %p2404_p10, %p2400_p7 }
  0x36   : > { %2408 = shalt.err (!%p2405_p11)
}
  0x37   : > { %s2923_s9 = smov 16   ;;  %s2924_s18 = smov 256  }
  0x38   : > { %2270 = dma.hbm_to_vmem [thread:$0]  (!%p2635_p0), %s257_s21, 8192, %s259_s16, %s244_s22, %s2924_s18, %s2924_s18, %s2923_s9  }
  0x39   : > { %270 = sbr.rel (%p2612_p5) target bundleno = 536 (0x218), region = 36 }
  0x3e   : > { %2479 = dma.done.wait (%p2597_p1), [#allocation7], 8192  }
  0x3f   : > { %2481 = vsyncadd (%p2597_p1), [#allocation7], 4294959104  ;;  %s277_s4 = sand.u32 1, %s2496_s0  }
  0x40   : > { %s1578_s19 = sshll.u32 %s277_s4, 9  ;;  %s278_s24 = scalar_lea.sflag [#allocation10], %s277_s4 }
  0x41   : > { %s2665_s14 = scalar_lea.vmem [#allocation9], %s1578_s19 }
  0x42   : > { %2483 = dma.done.wait (%p2605_p4), %s278_s24, 8192  }
  0x43   : > { %2485 = vsyncadd (%p2605_p4), %s278_s24, 4294959104  ;;  %v2674_v0 = vld [vmem:[%s2909_s3 + $0x4] sm:$0xf]  ;;  %v2679_v1 = vld [vmem:[%s2909_s3] sm:$0xf]  ;;  %p1579_p1 = scmp.ne.s32.totalorder %s2504_s1, 0 }
  0x44   : > { %v2684_v2 = vld [vmem:[%s2909_s3 + $0x4] sm:$0xf]  ;;  %v2689_v3 = vld [vmem:[%s2909_s3] sm:$0xf]  ;;  %v2694_v4 = vld [vmem:[%s2909_s3 + $0x8] sm:$0xf0] }
  0x45   : > { %v2699_v5 = vld [vmem:[%s2909_s3 + $0x4] sm:$0xf0]  ;;  %v2704_v6 = vld [vmem:[%s2909_s3 + $0x8] sm:$0xf0]  ;;  %336 = sbr.rel (%p1579_p1) target bundleno = 285 (0x11d), region = 48 }
  0x46   : > { %v2709_v7 = vld [vmem:[%s2909_s3 + $0x4] sm:$0xf0] }
  0x4a   : > { %v1702_v8 = vld [vmem:[#allocation6 + $0xe0] sm:$0xf]  ;;  %v2151_v9 = vld [vmem:[#allocation6 + $0xec] sm:$0xf0]  ;;  %v2149_v13 = vld [vmem:[#allocation6 + $0xe4] sm:$0xf] }
  0x4b   : > { %v1830_v10 = vld [vmem:[#allocation6 + $0x1e0] sm:$0xf]  ;;  %v1703_v11 = vor.u32 %v2151_v9, %v1702_v8  ;;  %v2183_v12 = vld [vmem:[#allocation6 + $0x1ec] sm:$0xf0]  ;;  %v1704_v14 = vld [vmem:[#allocation6 + $0xf0] sm:$0xf0] }
  0x4c   : > { %v1831_v15 = vor.u32 %v2183_v12, %v1830_v10  ;;  %v1707_v16 = vor.u32 %v2149_v13, %v1704_v14  ;;  %v2181_v17 = vld [vmem:[#allocation6 + $0x1e4] sm:$0xf]  ;;  %v1832_v18 = vld [vmem:[#allocation6 + $0x1f0] sm:$0xf0]  ;;  %v1686_v19 = vld [vmem:[#allocation6 + $0xc0] sm:$0xf] }
  0x4d   : > { %731 = vmatpush.bf16.msra.mxu0 %v1703_v11  ;;  %v1835_v20 = vor.u32 %v2181_v17, %v1832_v18  ;;  %v2147_v21 = vld [vmem:[#allocation6 + $0xcc] sm:$0xf0]  ;;  %v1814_v22 = vld [vmem:[#allocation6 + $0x1c0] sm:$0xf]  ;;  %v2145_v26 = vld [vmem:[#allocation6 + $0xc4] sm:$0xf] }
  0x4e   : > { %v2179_v23 = vld [vmem:[#allocation6 + $0x1cc] sm:$0xf0]  ;;  %745 = vmatpush.bf16.msra.mxu1 %v1831_v15  ;;  %759 = vmatpush.bf16.msra.mxu2 %v1707_v16  ;;  %v1687_v24 = vor.u32 %v2147_v21, %v1686_v19  ;;  %v1688_v27 = vld [vmem:[#allocation6 + $0xd0] sm:$0xf0]  ;;  %v2177_v28 = vld [vmem:[#allocation6 + $0x1c4] sm:$0xf] }
  0x4f   : > { %v1815_v25 = vor.u32 %v2179_v23, %v1814_v22  ;;  %773 = vmatpush.bf16.msra.mxu3 %v1835_v20  ;;  %v1691_v29 = vor.u32 %v2145_v26, %v1688_v27  ;;  %v1816_v30 = vld [vmem:[#allocation6 + $0x1d0] sm:$0xf0]  ;;  %v1670_v31 = vld [vmem:[#allocation6 + $0xa0] sm:$0xf]  ;;  %v2143_v32 = vld [vmem:[#allocation6 + $0xac] sm:$0xf0] }
  0x50   : > { %v1819_v33 = vor.u32 %v2177_v28, %v1816_v30  ;;  %v1798_v34 = vld [vmem:[#allocation6 + $0x1a0] sm:$0xf]  ;;  %v2175_v35 = vld [vmem:[#allocation6 + $0x1ac] sm:$0xf0]  ;;  %v2141_v36 = vld [vmem:[#allocation6 + $0xa4] sm:$0xf]  ;;  %v1671_v37 = vor.u32 %v2143_v32, %v1670_v31 }
  0x51   : > { %732 = vmatpush.bf16.msra.mxu0 %v1687_v24  ;;  %v1672_v38 = vld [vmem:[#allocation6 + $0xb0] sm:$0xf0]  ;;  %v2173_v39 = vld [vmem:[#allocation6 + $0x1a4] sm:$0xf]  ;;  %v1799_v41 = vor.u32 %v2175_v35, %v1798_v34  ;;  %v1654_v43 = vld [vmem:[#allocation6 + $0x80] sm:$0xf] }
  0x52   : > { %v1800_v40 = vld [vmem:[#allocation6 + $0x1b0] sm:$0xf0]  ;;  %746 = vmatpush.bf16.msra.mxu1 %v1815_v25  ;;  %760 = vmatpush.bf16.msra.mxu2 %v1691_v29  ;;  %v1675_v42 = vor.u32 %v2141_v36, %v1672_v38  ;;  %v2139_v44 = vld [vmem:[#allocation6 + $0x8c] sm:$0xf0]  ;;  %v1782_v45 = vld [vmem:[#allocation6 + $0x180] sm:$0xf] }
  0x53   : > { %774 = vmatpush.bf16.msra.mxu3 %v1819_v33  ;;  %v1803_v46 = vor.u32 %v2173_v39, %v1800_v40  ;;  %v2171_v47 = vld [vmem:[#allocation6 + $0x18c] sm:$0xf0]  ;;  %v2137_v48 = vld [vmem:[#allocation6 + $0x84] sm:$0xf]  ;;  %v1656_v49 = vld [vmem:[#allocation6 + $0x90] sm:$0xf0]  ;;  %v1655_v52 = vor.u32 %v2139_v44, %v1654_v43 }
  0x54   : > { %v2169_v50 = vld [vmem:[#allocation6 + $0x184] sm:$0xf]  ;;  %v1784_v51 = vld [vmem:[#allocation6 + $0x190] sm:$0xf0]  ;;  %v1783_v53 = vor.u32 %v2171_v47, %v1782_v45  ;;  %v1659_v54 = vor.u32 %v2137_v48, %v1656_v49  ;;  %v1638_v55 = vld [vmem:[#allocation6 + $0x60] sm:$0xf] }
  0x55   : > { %733 = vmatpush.bf16.msra.mxu0 %v1671_v37  ;;  %v2135_v56 = vld [vmem:[#allocation6 + $0x6c] sm:$0xf0]  ;;  %v1766_v57 = vld [vmem:[#allocation6 + $0x160] sm:$0xf]  ;;  %v1787_v58 = vor.u32 %v2169_v50, %v1784_v51  ;;  %v2133_v60 = vld [vmem:[#allocation6 + $0x64] sm:$0xf] }
  0x56   : > { %747 = vmatpush.bf16.msra.mxu1 %v1799_v41  ;;  %761 = vmatpush.bf16.msra.mxu2 %v1675_v42  ;;  %v2167_v59 = vld [vmem:[#allocation6 + $0x16c] sm:$0xf0]  ;;  %v1640_v61 = vld [vmem:[#allocation6 + $0x70] sm:$0xf0]  ;;  %v2165_v62 = vld [vmem:[#allocation6 + $0x164] sm:$0xf]  ;;  %v1639_v8 = vor.u32 %v2135_v56, %v1638_v55 }
  0x57   : > { %775 = vmatpush.bf16.msra.mxu3 %v1803_v46  ;;  %v1768_v63 = vld [vmem:[#allocation6 + $0x170] sm:$0xf0]  ;;  %v1767_v9 = vor.u32 %v2167_v59, %v1766_v57  ;;  %v1643_v10 = vor.u32 %v2133_v60, %v1640_v61  ;;  %v1622_v11 = vld [vmem:[#allocation6 + $0x40] sm:$0xf]  ;;  %v2131_v12 = vld [vmem:[#allocation6 + $0x4c] sm:$0xf0] }
  0x58   : > { %v1750_v13 = vld [vmem:[#allocation6 + $0x140] sm:$0xf]  ;;  %v1771_v14 = vor.u32 %v2165_v62, %v1768_v63  ;;  %v2163_v15 = vld [vmem:[#allocation6 + $0x14c] sm:$0xf0]  ;;  %v2129_v16 = vld [vmem:[#allocation6 + $0x44] sm:$0xf]  ;;  %v1623_v20 = vor.u32 %v2131_v12, %v1622_v11 }
  0x59   : > { %734 = vmatpush.bf16.msra.mxu0 %v1655_v52  ;;  %v1624_v17 = vld [vmem:[#allocation6 + $0x50] sm:$0xf0]  ;;  %v2161_v18 = vld [vmem:[#allocation6 + $0x144] sm:$0xf]  ;;  %v1751_v21 = vor.u32 %v2163_v15, %v1750_v13  ;;  %v1606_v23 = vld [vmem:[#allocation6 + $0x20] sm:$0xf]  ;;  %v2718_v13 = vor.u32 %v2684_v2, %v2704_v6 }
  0x5a   : > { %748 = vmatpush.bf16.msra.mxu1 %v1783_v53  ;;  %762 = vmatpush.bf16.msra.mxu2 %v1659_v54  ;;  %v1752_v19 = vld [vmem:[#allocation6 + $0x150] sm:$0xf0]  ;;  %v1627_v22 = vor.u32 %v2129_v16, %v1624_v17  ;;  %v2127_v24 = vld [vmem:[#allocation6 + $0x2c] sm:$0xf0]  ;;  %v1734_v25 = vld [vmem:[#allocation6 + $0x120] sm:$0xf] }
  0x5b   : > { %776 = vmatpush.bf16.msra.mxu3 %v1787_v58  ;;  %v1755_v26 = vor.u32 %v2161_v18, %v1752_v19  ;;  %v2159_v27 = vld [vmem:[#allocation6 + $0x12c] sm:$0xf0]  ;;  %v2125_v28 = vld [vmem:[#allocation6 + $0x24] sm:$0xf]  ;;  %v1608_v29 = vld [vmem:[#allocation6 + $0x30] sm:$0xf0]  ;;  %v1607_v32 = vor.u32 %v2127_v24, %v1606_v23 }
  0x5c   : > { %v2157_v30 = vld [vmem:[#allocation6 + $0x124] sm:$0xf]  ;;  %v1736_v31 = vld [vmem:[#allocation6 + $0x130] sm:$0xf0]  ;;  %v1590_v33 = vld [vmem:[#allocation6] sm:$0xf]  ;;  %v1735_v35 = vor.u32 %v2159_v27, %v1734_v25  ;;  %v1611_v36 = vor.u32 %v2125_v28, %v1608_v29 }
  0x5d   : > { %735 = vmatpush.bf16.msra.mxu0 %v1639_v8  ;;  %v2123_v34 = vld [vmem:[#allocation6 + $0xc] sm:$0xf0]  ;;  %v1718_v37 = vld [vmem:[#allocation6 + $0x100] sm:$0xf]  ;;  %v2121_v39 = vld [vmem:[#allocation6 + $0x4] sm:$0xf]  ;;  %v1739_v40 = vor.u32 %v2157_v30, %v1736_v31 }
  0x5e   : > { %749 = vmatpush.bf16.msra.mxu1 %v1767_v9  ;;  %763 = vmatpush.bf16.msra.mxu2 %v1643_v10  ;;  %v2155_v38 = vld [vmem:[#allocation6 + $0x10c] sm:$0xf0]  ;;  %v1592_v41 = vld [vmem:[#allocation6 + $0x10] sm:$0xf0]  ;;  %v2153_v42 = vld [vmem:[#allocation6 + $0x104] sm:$0xf]  ;;  %v1591_v47 = vor.u32 %v2123_v34, %v1590_v33  ;;  %v2714_v10 = vor.u32 %v2709_v7, %v2689_v3 }
  0x5f   : > { %777 = vmatpush.bf16.msra.mxu3 %v1771_v14  ;;  %v1720_v43 = vld [vmem:[#allocation6 + $0x110] sm:$0xf0]  ;;  %v1710_v44 = vld [vmem:[#allocation6 + $0xe8] sm:$0xf]  ;;  %v2152_v45 = vld [vmem:[#allocation6 + $0xf4] sm:$0xf0]  ;;  %v1719_v51 = vor.u32 %v2155_v38, %v1718_v37  ;;  %v1595_v52 = vor.u32 %v2121_v39, %v1592_v41 }
  0x60   : > { %v1838_v46 = vld [vmem:[#allocation6 + $0x1e8] sm:$0xf]  ;;  %v2184_v48 = vld [vmem:[#allocation6 + $0x1f4] sm:$0xf0]  ;;  %v2150_v49 = vld [vmem:[#allocation6 + $0xec] sm:$0xf]  ;;  %v1723_v55 = vor.u32 %v2153_v42, %v1720_v43  ;;  %v1711_v56 = vor.u32 %v2152_v45, %v1710_v44 }
  0x61   : > { %736 = vmatpush.bf16.msra.mxu0 %v1623_v20  ;;  %v1712_v50 = vld [vmem:[#allocation6 + $0xf8] sm:$0xf0]  ;;  %v2182_v53 = vld [vmem:[#allocation6 + $0x1ec] sm:$0xf]  ;;  %v1839_v57 = vor.u32 %v2184_v48, %v1838_v46  ;;  %v1694_v59 = vld [vmem:[#allocation6 + $0xc8] sm:$0xf] }
  0x62   : > { %750 = vmatpush.bf16.msra.mxu1 %v1751_v21  ;;  %764 = vmatpush.bf16.msra.mxu2 %v1627_v22  ;;  %v1840_v54 = vld [vmem:[#allocation6 + $0x1f8] sm:$0xf0]  ;;  %v1715_v58 = vor.u32 %v2150_v49, %v1712_v50  ;;  %v2148_v60 = vld [vmem:[#allocation6 + $0xd4] sm:$0xf0]  ;;  %v1822_v61 = vld [vmem:[#allocation6 + $0x1c8] sm:$0xf] }
  0x63   : > { %778 = vmatpush.bf16.msra.mxu3 %v1755_v26  ;;  %v1843_v62 = vor.u32 %v2182_v53, %v1840_v54  ;;  %v2180_v63 = vld [vmem:[#allocation6 + $0x1d4] sm:$0xf0]  ;;  %v2146_v8 = vld [vmem:[#allocation6 + $0xcc] sm:$0xf]  ;;  %v1696_v9 = vld [vmem:[#allocation6 + $0xd8] sm:$0xf0]  ;;  %v1695_v14 = vor.u32 %v2148_v60, %v1694_v59 }
  0x64   : > { %v2178_v11 = vld [vmem:[#allocation6 + $0x1cc] sm:$0xf]  ;;  %v1824_v12 = vld [vmem:[#allocation6 + $0x1d8] sm:$0xf0]  ;;  %v1823_v15 = vor.u32 %v2180_v63, %v1822_v61  ;;  %v1699_v16 = vor.u32 %v2146_v8, %v1696_v9  ;;  %v1678_v17 = vld [vmem:[#allocation6 + $0xa8] sm:$0xf] }
  0x65   : > { %737 = vmatpush.bf16.msra.mxu0 %v1607_v32  ;;  %v2144_v18 = vld [vmem:[#allocation6 + $0xb4] sm:$0xf0]  ;;  %v1806_v19 = vld [vmem:[#allocation6 + $0x1a8] sm:$0xf]  ;;  %v1827_v3 = vor.u32 %v2178_v11, %v1824_v12  ;;  %v2142_v20 = vld [vmem:[#allocation6 + $0xac] sm:$0xf] }
  0x66   : > { %751 = vmatpush.bf16.msra.mxu1 %v1735_v35  ;;  %765 = vmatpush.bf16.msra.mxu2 %v1611_v36  ;;  %v2176_v7 = vld [vmem:[#allocation6 + $0x1b4] sm:$0xf0]  ;;  %v1680_v21 = vld [vmem:[#allocation6 + $0xb8] sm:$0xf0]  ;;  %v2174_v2 = vld [vmem:[#allocation6 + $0x1ac] sm:$0xf]  ;;  %v1679_v22 = vor.u32 %v2144_v18, %v1678_v17 }
  0x67   : > { %779 = vmatpush.bf16.msra.mxu3 %v1739_v40  ;;  %v1808_v6 = vld [vmem:[#allocation6 + $0x1b8] sm:$0xf0]  ;;  %v1807_v23 = vor.u32 %v2176_v7, %v1806_v19  ;;  %v1683_v24 = vor.u32 %v2142_v20, %v1680_v21  ;;  %v1662_v25 = vld [vmem:[#allocation6 + $0x88] sm:$0xf]  ;;  %v2140_v26 = vld [vmem:[#allocation6 + $0x94] sm:$0xf0] }
  0x68   : > { %v1790_v27 = vld [vmem:[#allocation6 + $0x188] sm:$0xf]  ;;  %v1811_v28 = vor.u32 %v2174_v2, %v1808_v6  ;;  %v2172_v29 = vld [vmem:[#allocation6 + $0x194] sm:$0xf0]  ;;  %v2138_v30 = vld [vmem:[#allocation6 + $0x8c] sm:$0xf]  ;;  %v1663_v34 = vor.u32 %v2140_v26, %v1662_v25 }
  0x69   : > { %738 = vmatpush.bf16.msra.mxu0 %v1591_v47  ;;  %v1664_v31 = vld [vmem:[#allocation6 + $0x98] sm:$0xf0]  ;;  %v2170_v32 = vld [vmem:[#allocation6 + $0x18c] sm:$0xf]  ;;  %v1791_v35 = vor.u32 %v2172_v29, %v1790_v27  ;;  %v1646_v37 = vld [vmem:[#allocation6 + $0x68] sm:$0xf] }
  0x6a   : > { %752 = vmatpush.bf16.msra.mxu1 %v1719_v51  ;;  %766 = vmatpush.bf16.msra.mxu2 %v1595_v52  ;;  %v1792_v33 = vld [vmem:[#allocation6 + $0x198] sm:$0xf0]  ;;  %v1667_v36 = vor.u32 %v2138_v30, %v1664_v31  ;;  %v2136_v38 = vld [vmem:[#allocation6 + $0x74] sm:$0xf0]  ;;  %v1774_v39 = vld [vmem:[#allocation6 + $0x168] sm:$0xf] }
  0x6b   : > { %780 = vmatpush.bf16.msra.mxu3 %v1723_v55  ;;  %v1795_v40 = vor.u32 %v2170_v32, %v1792_v33  ;;  %v2168_v41 = vld [vmem:[#allocation6 + $0x174] sm:$0xf0]  ;;  %v2134_v42 = vld [vmem:[#allocation6 + $0x6c] sm:$0xf]  ;;  %v1648_v43 = vld [vmem:[#allocation6 + $0x78] sm:$0xf0]  ;;  %v1647_v46 = vor.u32 %v2136_v38, %v1646_v37 }
  0x6c   : > { %739 = vmatmul.bf16.vlgmr.msra.gmra.mxu0 %v2714_v10  ;;  %v2166_v44 = vld [vmem:[#allocation6 + $0x16c] sm:$0xf]  ;;  %v1776_v45 = vld [vmem:[#allocation6 + $0x178] sm:$0xf0]  ;;  %v1775_v47 = vor.u32 %v2168_v41, %v1774_v39  ;;  %v1651_v48 = vor.u32 %v2134_v42, %v1648_v43  ;;  %v1630_v49 = vld [vmem:[#allocation6 + $0x48] sm:$0xf] }
  0x6d   : > { %787 = vmatpush.bf16.msrb.mxu0 %v1711_v56  ;;  %767 = vmatmul.bf16.vlgmr.msra.gmra.mxu2 %v2714_v10  ;;  %v2132_v50 = vld [vmem:[#allocation6 + $0x54] sm:$0xf0]  ;;  %v1758_v51 = vld [vmem:[#allocation6 + $0x148] sm:$0xf]  ;;  %v1779_v52 = vor.u32 %v2166_v44, %v1776_v45  ;;  %v2130_v54 = vld [vmem:[#allocation6 + $0x4c] sm:$0xf] }
  0x6e   : > { %801 = vmatpush.bf16.msrb.mxu1 %v1839_v57  ;;  %815 = vmatpush.bf16.msrb.mxu2 %v1715_v58  ;;  %v2164_v53 = vld [vmem:[#allocation6 + $0x154] sm:$0xf0]  ;;  %v1632_v55 = vld [vmem:[#allocation6 + $0x58] sm:$0xf0]  ;;  %v2162_v56 = vld [vmem:[#allocation6 + $0x14c] sm:$0xf]  ;;  %v1631_v58 = vor.u32 %v2132_v50, %v1630_v49 }
  0x6f   : > { %829 = vmatpush.bf16.msrb.mxu3 %v1843_v62  ;;  %753 = vmatmul.bf16.vlgmr.msra.gmra.mxu1 %v2718_v13  ;;  %v1760_v57 = vld [vmem:[#allocation6 + $0x158] sm:$0xf0]  ;;  %v1759_v59 = vor.u32 %v2164_v53, %v1758_v51  ;;  %v1635_v60 = vor.u32 %v2130_v54, %v1632_v55  ;;  %v1614_v61 = vld [vmem:[#allocation6 + $0x28] sm:$0xf]  ;;  %v2128_v62 = vld [vmem:[#allocation6 + $0x34] sm:$0xf0] }
  0x70   : > { %781 = vmatmul.bf16.vlgmr.msra.gmra.mxu3 %v2718_v13  ;;  %v1742_v63 = vld [vmem:[#allocation6 + $0x128] sm:$0xf]  ;;  %v1763_v8 = vor.u32 %v2162_v56, %v1760_v57  ;;  %v2160_v9 = vld [vmem:[#allocation6 + $0x134] sm:$0xf0]  ;;  %v2126_v11 = vld [vmem:[#allocation6 + $0x2c] sm:$0xf] }
  0x71   : > { %788 = vmatpush.bf16.msrb.mxu0 %v1695_v14  ;;  %v1616_v12 = vld [vmem:[#allocation6 + $0x38] sm:$0xf0]  ;;  %v2158_v14 = vld [vmem:[#allocation6 + $0x12c] sm:$0xf]  ;;  %v1743_v17 = vor.u32 %v2160_v9, %v1742_v63  ;;  %v1598_v19 = vld [vmem:[#allocation6 + $0x8] sm:$0xf] }
  0x72   : > { %802 = vmatpush.bf16.msrb.mxu1 %v1823_v15  ;;  %816 = vmatpush.bf16.msrb.mxu2 %v1699_v16  ;;  %v1744_v15 = vld [vmem:[#allocation6 + $0x138] sm:$0xf0]  ;;  %v1615_v16 = vor.u32 %v2128_v62, %v1614_v61  ;;  %v1619_v18 = vor.u32 %v2126_v11, %v1616_v12  ;;  %v1726_v7 = vld [vmem:[#allocation6 + $0x108] sm:$0xf]  ;;  %v2156_v21 = vld [vmem:[#allocation6 + $0x114] sm:$0xf0] }
  0x73   : > { %830 = vmatpush.bf16.msrb.mxu3 %v1827_v3  ;;  %v2124_v3 = vld [vmem:[#allocation6 + $0x14] sm:$0xf0]  ;;  %v1747_v20 = vor.u32 %v2158_v14, %v1744_v15  ;;  %v2122_v2 = vld [vmem:[#allocation6 + $0xc] sm:$0xf]  ;;  %v1600_v6 = vld [vmem:[#allocation6 + $0x18] sm:$0xf0]  ;;  %v1727_v25 = vor.u32 %v2156_v21, %v1726_v7 }
  0x74   : > { %v1603_v26 = vor.u32 %v2122_v2, %v1600_v6 }
  0x75   : > { %789 = vmatpush.bf16.msrb.mxu0 %v1679_v22  ;;  %v2154_v22 = vld [vmem:[#allocation6 + $0x10c] sm:$0xf] }
  0x76   : > { %803 = vmatpush.bf16.msrb.mxu1 %v1807_v23  ;;  %817 = vmatpush.bf16.msrb.mxu2 %v1683_v24  ;;  %v1728_v23 = vld [vmem:[#allocation6 + $0x118] sm:$0xf0]  ;;  %v1599_v24 = vor.u32 %v2124_v3, %v1598_v19 }
  0x77   : > { %831 = vmatpush.bf16.msrb.mxu3 %v1811_v28  ;;  %v1731_v27 = vor.u32 %v2154_v22, %v1728_v23 }
  0x79   : > { %790 = vmatpush.bf16.msrb.mxu0 %v1663_v34 }
  0x7a   : > { %804 = vmatpush.bf16.msrb.mxu1 %v1791_v35  ;;  %818 = vmatpush.bf16.msrb.mxu2 %v1667_v36 }
  0x7b   : > { %832 = vmatpush.bf16.msrb.mxu3 %v1795_v40 }
  0x7d   : > { %791 = vmatpush.bf16.msrb.mxu0 %v1647_v46 }
  0x7e   : > { %805 = vmatpush.bf16.msrb.mxu1 %v1775_v47  ;;  %819 = vmatpush.bf16.msrb.mxu2 %v1651_v48 }
  0x7f   : > { %833 = vmatpush.bf16.msrb.mxu3 %v1779_v52 }
  0x81   : > { %792 = vmatpush.bf16.msrb.mxu0 %v1631_v58 }
  0x82   : > { %806 = vmatpush.bf16.msrb.mxu1 %v1759_v59  ;;  %820 = vmatpush.bf16.msrb.mxu2 %v1635_v60 }
  0x83   : > { %834 = vmatpush.bf16.msrb.mxu3 %v1763_v8 }
  0x85   : > { %793 = vmatpush.bf16.msrb.mxu0 %v1615_v16 }
  0x86   : > { %807 = vmatpush.bf16.msrb.mxu1 %v1743_v17  ;;  %821 = vmatpush.bf16.msrb.mxu2 %v1619_v18 }
  0x87   : > { %835 = vmatpush.bf16.msrb.mxu3 %v1747_v20 }
  0x89   : > { %794 = vmatpush.bf16.msrb.mxu0 %v1599_v24 }
  0x8a   : > { %808 = vmatpush.bf16.msrb.mxu1 %v1727_v25  ;;  %822 = vmatpush.bf16.msrb.mxu2 %v1603_v26 }
  0x8b   : > { %836 = vmatpush.bf16.msrb.mxu3 %v1731_v27 }
  0x8c   : > { %795 = vmatmul.bf16.vlgmr.msrb.gmra.mxu0 %v2714_v10 }
  0x8d   : > { %809 = vmatmul.bf16.vlgmr.msrb.gmra.mxu1 %v2718_v13  ;;  %823 = vmatmul.bf16.vlgmr.msrb.gmra.mxu2 %v2714_v10 }
  0x8e   : > { %837 = vmatmul.bf16.vlgmr.msrb.gmra.mxu3 %v2718_v13 }
  0xe9   : > { %v740_v28 = vpop.f32.mrf.mxu0 }
  0xec   : > { %v754_v29 = vpop.f32.mrf.mxu1 }
  0xed   : > { %v755_v30 = vadd.f32 %v754_v29, %v740_v28 }
  0xef   : > { %843 = vst [vmem:[#allocation2 + $0x30] sm:$0xff] %v755_v30 }
  0xf0   : > { %v768_v31 = vpop.f32.mrf.mxu2 }
  0xf1   : > { %v742_v34 = vpop.f32.mrf.mxu0 }
  0xf3   : > { %v782_v32 = vpop.f32.mrf.mxu3 }
  0xf4   : > { %v783_v33 = vadd.f32 %v782_v32, %v768_v31  ;;  %v756_v35 = vpop.f32.mrf.mxu1 }
  0xf5   : > { %v757_v36 = vadd.f32 %v756_v35, %v742_v34 }
  0xf6   : > { %844 = vst [vmem:[#allocation2] sm:$0xff] %v783_v33 }
  0xf7   : > { %847 = vst [vmem:[#allocation2 + $0x8] sm:$0xff] %v757_v36 }
  0xf8   : > { %v770_v37 = vpop.f32.mrf.mxu2 }
  0xfb   : > { %v784_v38 = vpop.f32.mrf.mxu3 }
  0xfc   : > { %v785_v39 = vadd.f32 %v784_v38, %v770_v37 }
  0xfe   : > { %848 = vst [vmem:[#allocation2 + $0x20] sm:$0xff] %v785_v39 }
 0x109   : > { %v796_v40 = vpop.f32.mrf.mxu0 }
 0x10a   : > { %v810_v10 = vpop.f32.mrf.mxu1 }
 0x10b   : > { %v811_v41 = vadd.f32 %v810_v10, %v796_v40 }
 0x10d   : > { %845 = vst [vmem:[#allocation2 + $0x18] sm:$0xff] %v811_v41 }
 0x110   : > { %v824_v13 = vpop.f32.mrf.mxu2 }
 0x111   : > { %v838_v42 = vpop.f32.mrf.mxu3  ;;  %v798_v43 = vpop.f32.mrf.mxu0 }
 0x112   : > { %v839_v44 = vadd.f32 %v838_v42, %v824_v13  ;;  %v812_v45 = vpop.f32.mrf.mxu1 }
 0x113   : > { %v813_v46 = vadd.f32 %v812_v45, %v798_v43 }
 0x114   : > { %846 = vst [vmem:[#allocation2 + $0x10] sm:$0xff] %v839_v44 }
 0x115   : > { %849 = vst [vmem:[#allocation2 + $0x28] sm:$0xff] %v813_v46 }
 0x118   : > { %v826_v47 = vpop.f32.mrf.mxu2 }
 0x119   : > { %v840_v48 = vpop.f32.mrf.mxu3 }
 0x11a   : > { %v841_v49 = vadd.f32 %v840_v48, %v826_v47 }
 0x11c   : > { %850 = vst [vmem:[#allocation2 + $0x38] sm:$0xff] %v841_v49 }
 0x11d PF: > { %s853_s4 = sld [smem:[#allocation5 + %s2504_s1]] }
 0x123   : > { %p1844_p4 = scmp.le.s32.totalorder %s853_s4, 0 }
 0x124   : > { %s2844_s19 = sld [smem:[#allocation4 + %s2504_s1]] (!%p1844_p4) }
 0x125   : > { %857 = sbr.rel (%p1844_p4) target bundleno = 513 (0x201), region = 52 }
 0x12a   : > { %v1967_v50 = vld [vmem:[%s2665_s14 + $0xe0] sm:$0xf]  ;;  %v2215_v51 = vld [vmem:[%s2665_s14 + $0xec] sm:$0xf0]  ;;  %v2213_v55 = vld [vmem:[%s2665_s14 + $0xe4] sm:$0xf] }
 0x12b   : > { %v2095_v52 = vld [vmem:[%s2665_s14 + $0x1e0] sm:$0xf]  ;;  %v1968_v53 = vor.u32 %v2215_v51, %v1967_v50  ;;  %v2247_v54 = vld [vmem:[%s2665_s14 + $0x1ec] sm:$0xf0]  ;;  %v1969_v56 = vld [vmem:[%s2665_s14 + $0xf0] sm:$0xf0] }
 0x12c   : > { %v2096_v57 = vor.u32 %v2247_v54, %v2095_v52  ;;  %v1972_v58 = vor.u32 %v2213_v55, %v1969_v56  ;;  %v2245_v59 = vld [vmem:[%s2665_s14 + $0x1e4] sm:$0xf]  ;;  %v2097_v60 = vld [vmem:[%s2665_s14 + $0x1f0] sm:$0xf0]  ;;  %v1951_v61 = vld [vmem:[%s2665_s14 + $0xc0] sm:$0xf] }
 0x12d   : > { %1252 = vmatpush.bf16.msra.mxu0 %v1968_v53  ;;  %v2100_v62 = vor.u32 %v2245_v59, %v2097_v60  ;;  %v2211_v63 = vld [vmem:[%s2665_s14 + $0xcc] sm:$0xf0]  ;;  %v2079_v8 = vld [vmem:[%s2665_s14 + $0x1c0] sm:$0xf]  ;;  %v2209_v14 = vld [vmem:[%s2665_s14 + $0xc4] sm:$0xf] }
 0x12e   : > { %v2243_v9 = vld [vmem:[%s2665_s14 + $0x1cc] sm:$0xf0]  ;;  %1266 = vmatpush.bf16.msra.mxu1 %v2096_v57  ;;  %1280 = vmatpush.bf16.msra.mxu2 %v1972_v58  ;;  %v1952_v11 = vor.u32 %v2211_v63, %v1951_v61  ;;  %v1953_v15 = vld [vmem:[%s2665_s14 + $0xd0] sm:$0xf0]  ;;  %v2241_v16 = vld [vmem:[%s2665_s14 + $0x1c4] sm:$0xf] }
 0x12f   : > { %v2080_v12 = vor.u32 %v2243_v9, %v2079_v8  ;;  %1294 = vmatpush.bf16.msra.mxu3 %v2100_v62  ;;  %v1956_v17 = vor.u32 %v2209_v14, %v1953_v15  ;;  %v2081_v18 = vld [vmem:[%s2665_s14 + $0x1d0] sm:$0xf0]  ;;  %v1935_v19 = vld [vmem:[%s2665_s14 + $0xa0] sm:$0xf]  ;;  %v2207_v3 = vld [vmem:[%s2665_s14 + $0xac] sm:$0xf0] }
 0x130   : > { %v2084_v7 = vor.u32 %v2241_v16, %v2081_v18  ;;  %v2063_v20 = vld [vmem:[%s2665_s14 + $0x1a0] sm:$0xf]  ;;  %v2239_v21 = vld [vmem:[%s2665_s14 + $0x1ac] sm:$0xf0]  ;;  %v2205_v2 = vld [vmem:[%s2665_s14 + $0xa4] sm:$0xf]  ;;  %v1936_v6 = vor.u32 %v2207_v3, %v1935_v19 }
 0x131   : > { %1253 = vmatpush.bf16.msra.mxu0 %v1952_v11  ;;  %v1937_v22 = vld [vmem:[%s2665_s14 + $0xb0] sm:$0xf0]  ;;  %v2237_v23 = vld [vmem:[%s2665_s14 + $0x1a4] sm:$0xf]  ;;  %v2064_v25 = vor.u32 %v2239_v21, %v2063_v20  ;;  %v1919_v27 = vld [vmem:[%s2665_s14 + $0x80] sm:$0xf] }
 0x132   : > { %v2065_v24 = vld [vmem:[%s2665_s14 + $0x1b0] sm:$0xf0]  ;;  %1267 = vmatpush.bf16.msra.mxu1 %v2080_v12  ;;  %1281 = vmatpush.bf16.msra.mxu2 %v1956_v17  ;;  %v1940_v26 = vor.u32 %v2205_v2, %v1937_v22  ;;  %v2203_v28 = vld [vmem:[%s2665_s14 + $0x8c] sm:$0xf0]  ;;  %v2047_v29 = vld [vmem:[%s2665_s14 + $0x180] sm:$0xf] }
 0x133   : > { %1295 = vmatpush.bf16.msra.mxu3 %v2084_v7  ;;  %v2068_v30 = vor.u32 %v2237_v23, %v2065_v24  ;;  %v2235_v31 = vld [vmem:[%s2665_s14 + $0x18c] sm:$0xf0]  ;;  %v2201_v32 = vld [vmem:[%s2665_s14 + $0x84] sm:$0xf]  ;;  %v1921_v33 = vld [vmem:[%s2665_s14 + $0x90] sm:$0xf0]  ;;  %v1920_v36 = vor.u32 %v2203_v28, %v1919_v27 }
 0x134   : > { %v2233_v34 = vld [vmem:[%s2665_s14 + $0x184] sm:$0xf]  ;;  %v2049_v35 = vld [vmem:[%s2665_s14 + $0x190] sm:$0xf0]  ;;  %v2048_v37 = vor.u32 %v2235_v31, %v2047_v29  ;;  %v1924_v38 = vor.u32 %v2201_v32, %v1921_v33  ;;  %v1903_v39 = vld [vmem:[%s2665_s14 + $0x60] sm:$0xf] }
 0x135   : > { %1254 = vmatpush.bf16.msra.mxu0 %v1936_v6  ;;  %v2199_v40 = vld [vmem:[%s2665_s14 + $0x6c] sm:$0xf0]  ;;  %v2031_v10 = vld [vmem:[%s2665_s14 + $0x160] sm:$0xf]  ;;  %v2052_v41 = vor.u32 %v2233_v34, %v2049_v35  ;;  %v2197_v42 = vld [vmem:[%s2665_s14 + $0x64] sm:$0xf] }
 0x136   : > { %1268 = vmatpush.bf16.msra.mxu1 %v2064_v25  ;;  %1282 = vmatpush.bf16.msra.mxu2 %v1940_v26  ;;  %v2231_v13 = vld [vmem:[%s2665_s14 + $0x16c] sm:$0xf0]  ;;  %v1905_v43 = vld [vmem:[%s2665_s14 + $0x70] sm:$0xf0]  ;;  %v2229_v44 = vld [vmem:[%s2665_s14 + $0x164] sm:$0xf]  ;;  %v1904_v46 = vor.u32 %v2199_v40, %v1903_v39 }
 0x137   : > { %1296 = vmatpush.bf16.msra.mxu3 %v2068_v30  ;;  %v2033_v45 = vld [vmem:[%s2665_s14 + $0x170] sm:$0xf0]  ;;  %v2032_v47 = vor.u32 %v2231_v13, %v2031_v10  ;;  %v1908_v48 = vor.u32 %v2197_v42, %v1905_v43  ;;  %v1887_v49 = vld [vmem:[%s2665_s14 + $0x40] sm:$0xf]  ;;  %v2195_v50 = vld [vmem:[%s2665_s14 + $0x4c] sm:$0xf0] }
 0x138   : > { %v2015_v51 = vld [vmem:[%s2665_s14 + $0x140] sm:$0xf]  ;;  %v2036_v52 = vor.u32 %v2229_v44, %v2033_v45  ;;  %v2227_v53 = vld [vmem:[%s2665_s14 + $0x14c] sm:$0xf0]  ;;  %v2193_v54 = vld [vmem:[%s2665_s14 + $0x44] sm:$0xf]  ;;  %v1888_v58 = vor.u32 %v2195_v50, %v1887_v49  ;;  %v2809_v44 = vor.u32 %v2699_v5, %v2679_v1 }
 0x139   : > { %1255 = vmatpush.bf16.msra.mxu0 %v1920_v36  ;;  %v1889_v55 = vld [vmem:[%s2665_s14 + $0x50] sm:$0xf0]  ;;  %v2225_v56 = vld [vmem:[%s2665_s14 + $0x144] sm:$0xf]  ;;  %v2016_v59 = vor.u32 %v2227_v53, %v2015_v51  ;;  %v1871_v61 = vld [vmem:[%s2665_s14 + $0x20] sm:$0xf] }
 0x13a   : > { %1269 = vmatpush.bf16.msra.mxu1 %v2048_v37  ;;  %1283 = vmatpush.bf16.msra.mxu2 %v1924_v38  ;;  %v2017_v57 = vld [vmem:[%s2665_s14 + $0x150] sm:$0xf0]  ;;  %v1892_v60 = vor.u32 %v2193_v54, %v1889_v55  ;;  %v2191_v62 = vld [vmem:[%s2665_s14 + $0x2c] sm:$0xf0]  ;;  %v1999_v63 = vld [vmem:[%s2665_s14 + $0x120] sm:$0xf] }
 0x13b   : > { %1297 = vmatpush.bf16.msra.mxu3 %v2052_v41  ;;  %v2020_v8 = vor.u32 %v2225_v56, %v2017_v57  ;;  %v2223_v9 = vld [vmem:[%s2665_s14 + $0x12c] sm:$0xf0]  ;;  %v2189_v11 = vld [vmem:[%s2665_s14 + $0x24] sm:$0xf]  ;;  %v1873_v12 = vld [vmem:[%s2665_s14 + $0x30] sm:$0xf0]  ;;  %v1872_v16 = vor.u32 %v2191_v62, %v1871_v61 }
 0x13c   : > { %v2221_v14 = vld [vmem:[%s2665_s14 + $0x124] sm:$0xf]  ;;  %v2001_v15 = vld [vmem:[%s2665_s14 + $0x130] sm:$0xf0]  ;;  %v1855_v17 = vld [vmem:[%s2665_s14] sm:$0xf]  ;;  %v2000_v19 = vor.u32 %v2223_v9, %v1999_v63  ;;  %v1876_v3 = vor.u32 %v2189_v11, %v1873_v12 }
 0x13d   : > { %1256 = vmatpush.bf16.msra.mxu0 %v1904_v46  ;;  %v2187_v18 = vld [vmem:[%s2665_s14 + $0xc] sm:$0xf0]  ;;  %v1983_v7 = vld [vmem:[%s2665_s14 + $0x100] sm:$0xf]  ;;  %v2185_v21 = vld [vmem:[%s2665_s14 + $0x4] sm:$0xf]  ;;  %v2004_v2 = vor.u32 %v2221_v14, %v2001_v15 }
 0x13e   : > { %1270 = vmatpush.bf16.msra.mxu1 %v2032_v47  ;;  %1284 = vmatpush.bf16.msra.mxu2 %v1908_v48  ;;  %v2219_v20 = vld [vmem:[%s2665_s14 + $0x10c] sm:$0xf0]  ;;  %v1857_v6 = vld [vmem:[%s2665_s14 + $0x10] sm:$0xf0]  ;;  %v2217_v22 = vld [vmem:[%s2665_s14 + $0x104] sm:$0xf]  ;;  %v1856_v27 = vor.u32 %v2187_v18, %v1855_v17  ;;  %v2815_v47 = vor.u32 %v2674_v0, %v2694_v4 }
 0x13f   : > { %1298 = vmatpush.bf16.msra.mxu3 %v2036_v52  ;;  %v1985_v23 = vld [vmem:[%s2665_s14 + $0x110] sm:$0xf0]  ;;  %v1975_v24 = vld [vmem:[%s2665_s14 + $0xe8] sm:$0xf]  ;;  %v2216_v25 = vld [vmem:[%s2665_s14 + $0xf4] sm:$0xf0]  ;;  %v1984_v31 = vor.u32 %v2219_v20, %v1983_v7  ;;  %v1860_v32 = vor.u32 %v2185_v21, %v1857_v6 }
 0x140   : > { %v2103_v26 = vld [vmem:[%s2665_s14 + $0x1e8] sm:$0xf]  ;;  %v2248_v28 = vld [vmem:[%s2665_s14 + $0x1f4] sm:$0xf0]  ;;  %v2214_v29 = vld [vmem:[%s2665_s14 + $0xec] sm:$0xf]  ;;  %v1988_v35 = vor.u32 %v2217_v22, %v1985_v23  ;;  %v1976_v36 = vor.u32 %v2216_v25, %v1975_v24 }
 0x141   : > { %1257 = vmatpush.bf16.msra.mxu0 %v1888_v58  ;;  %v1977_v30 = vld [vmem:[%s2665_s14 + $0xf8] sm:$0xf0]  ;;  %v2246_v33 = vld [vmem:[%s2665_s14 + $0x1ec] sm:$0xf]  ;;  %v2104_v37 = vor.u32 %v2248_v28, %v2103_v26  ;;  %v1959_v39 = vld [vmem:[%s2665_s14 + $0xc8] sm:$0xf] }
 0x142   : > { %1271 = vmatpush.bf16.msra.mxu1 %v2016_v59  ;;  %1285 = vmatpush.bf16.msra.mxu2 %v1892_v60  ;;  %v2105_v34 = vld [vmem:[%s2665_s14 + $0x1f8] sm:$0xf0]  ;;  %v1980_v38 = vor.u32 %v2214_v29, %v1977_v30  ;;  %v2212_v40 = vld [vmem:[%s2665_s14 + $0xd4] sm:$0xf0]  ;;  %v2087_v10 = vld [vmem:[%s2665_s14 + $0x1c8] sm:$0xf] }
 0x143   : > { %1299 = vmatpush.bf16.msra.mxu3 %v2020_v8  ;;  %v2108_v41 = vor.u32 %v2246_v33, %v2105_v34  ;;  %v2244_v13 = vld [vmem:[%s2665_s14 + $0x1d4] sm:$0xf0]  ;;  %v2210_v42 = vld [vmem:[%s2665_s14 + $0xcc] sm:$0xf]  ;;  %v1961_v43 = vld [vmem:[%s2665_s14 + $0xd8] sm:$0xf0]  ;;  %v1960_v48 = vor.u32 %v2212_v40, %v1959_v39  ;;  %v1367_v40 = vstv %s2844_s19 }
 0x144   : > { %v2242_v45 = vld [vmem:[%s2665_s14 + $0x1cc] sm:$0xf]  ;;  %v2089_v46 = vld [vmem:[%s2665_s14 + $0x1d8] sm:$0xf0]  ;;  %v2088_v1 = vor.u32 %v2244_v13, %v2087_v10  ;;  %v1964_v5 = vor.u32 %v2210_v42, %v1961_v43  ;;  %v1943_v49 = vld [vmem:[%s2665_s14 + $0xa8] sm:$0xf] }
 0x145   : > { %1258 = vmatpush.bf16.msra.mxu0 %v1872_v16  ;;  %v2208_v50 = vld [vmem:[%s2665_s14 + $0xb4] sm:$0xf0]  ;;  %v2071_v51 = vld [vmem:[%s2665_s14 + $0x1a8] sm:$0xf]  ;;  %v2092_v52 = vor.u32 %v2242_v45, %v2089_v46  ;;  %v2206_v4 = vld [vmem:[%s2665_s14 + $0xac] sm:$0xf] }
 0x146   : > { %1272 = vmatpush.bf16.msra.mxu1 %v2000_v19  ;;  %1286 = vmatpush.bf16.msra.mxu2 %v1876_v3  ;;  %v2240_v0 = vld [vmem:[%s2665_s14 + $0x1b4] sm:$0xf0]  ;;  %v1945_v53 = vld [vmem:[%s2665_s14 + $0xb8] sm:$0xf0]  ;;  %v2238_v54 = vld [vmem:[%s2665_s14 + $0x1ac] sm:$0xf]  ;;  %v1944_v56 = vor.u32 %v2208_v50, %v1943_v49 }
 0x147   : > { %1300 = vmatpush.bf16.msra.mxu3 %v2004_v2  ;;  %v2073_v55 = vld [vmem:[%s2665_s14 + $0x1b8] sm:$0xf0]  ;;  %v2072_v57 = vor.u32 %v2240_v0, %v2071_v51  ;;  %v1948_v58 = vor.u32 %v2206_v4, %v1945_v53  ;;  %v1927_v59 = vld [vmem:[%s2665_s14 + $0x88] sm:$0xf]  ;;  %v2204_v60 = vld [vmem:[%s2665_s14 + $0x94] sm:$0xf0] }
 0x148   : > { %v2055_v61 = vld [vmem:[%s2665_s14 + $0x188] sm:$0xf]  ;;  %v2076_v62 = vor.u32 %v2238_v54, %v2073_v55  ;;  %v2236_v63 = vld [vmem:[%s2665_s14 + $0x194] sm:$0xf0]  ;;  %v2202_v8 = vld [vmem:[%s2665_s14 + $0x8c] sm:$0xf]  ;;  %v1928_v14 = vor.u32 %v2204_v60, %v1927_v59 }
 0x149   : > { %1259 = vmatpush.bf16.msra.mxu0 %v1856_v27  ;;  %v1929_v9 = vld [vmem:[%s2665_s14 + $0x98] sm:$0xf0]  ;;  %v2234_v11 = vld [vmem:[%s2665_s14 + $0x18c] sm:$0xf]  ;;  %v1911_v15 = vld [vmem:[%s2665_s14 + $0x68] sm:$0xf]  ;;  %v2056_v17 = vor.u32 %v2236_v63, %v2055_v61 }
 0x14a   : > { %1273 = vmatpush.bf16.msra.mxu1 %v1984_v31  ;;  %1287 = vmatpush.bf16.msra.mxu2 %v1860_v32  ;;  %v2057_v12 = vld [vmem:[%s2665_s14 + $0x198] sm:$0xf0]  ;;  %v2200_v16 = vld [vmem:[%s2665_s14 + $0x74] sm:$0xf0]  ;;  %v1932_v18 = vor.u32 %v2202_v8, %v1929_v9  ;;  %v2039_v19 = vld [vmem:[%s2665_s14 + $0x168] sm:$0xf] }
 0x14b   : > { %1301 = vmatpush.bf16.msra.mxu3 %v1988_v35  ;;  %v2232_v3 = vld [vmem:[%s2665_s14 + $0x174] sm:$0xf0]  ;;  %v2060_v7 = vor.u32 %v2234_v11, %v2057_v12  ;;  %v2198_v20 = vld [vmem:[%s2665_s14 + $0x6c] sm:$0xf]  ;;  %v1913_v21 = vld [vmem:[%s2665_s14 + $0x78] sm:$0xf0]  ;;  %v1912_v23 = vor.u32 %v2200_v16, %v1911_v15 }
 0x14c   : > { %1260 = vmatmul.bf16.vlgmr.msra.gmra.mxu0 %v2809_v44  ;;  %v2519_v2 = vmov 0   ;;  %v2230_v6 = vld [vmem:[%s2665_s14 + $0x16c] sm:$0xf]  ;;  %v2041_v22 = vld [vmem:[%s2665_s14 + $0x178] sm:$0xf0]  ;;  %v2040_v26 = vor.u32 %v2232_v3, %v2039_v19  ;;  %v1916_v27 = vor.u32 %v2198_v20, %v1913_v21  ;;  %v1364_v33 = vld [vmem:[%s2908_s2] sm:$0xff] }
 0x14d   : > { %1308 = vmatpush.bf16.msrb.mxu0 %v1976_v36  ;;  %1288 = vmatmul.bf16.vlgmr.msra.gmra.mxu2 %v2809_v44  ;;  %v1895_v24 = vld [vmem:[%s2665_s14 + $0x48] sm:$0xf]  ;;  %v2196_v25 = vld [vmem:[%s2665_s14 + $0x54] sm:$0xf0]  ;;  %v2194_v30 = vld [vmem:[%s2665_s14 + $0x4c] sm:$0xf]  ;;  %v2044_v31 = vor.u32 %v2230_v6, %v2041_v22  ;;  %vm1368_vm0 = vcmp.eq.s32.totalorder %v1364_v33, %v1367_v40 }
 0x14e   : > { %1322 = vmatpush.bf16.msrb.mxu1 %v2104_v37  ;;  %1336 = vmatpush.bf16.msrb.mxu2 %v1980_v38  ;;  %v2023_v28 = vld [vmem:[%s2665_s14 + $0x148] sm:$0xf]  ;;  %v2228_v29 = vld [vmem:[%s2665_s14 + $0x154] sm:$0xf0]  ;;  %v1897_v32 = vld [vmem:[%s2665_s14 + $0x58] sm:$0xf0]  ;;  %v1896_v37 = vor.u32 %v2196_v25, %v1895_v24 }
 0x14f   : > { %1350 = vmatpush.bf16.msrb.mxu3 %v2108_v41  ;;  %1274 = vmatmul.bf16.vlgmr.msra.gmra.mxu1 %v2815_v47  ;;  %v1365_v34 = vld [vmem:[%s2908_s2 + $0x8] sm:$0xff]  ;;  %v2025_v36 = vld [vmem:[%s2665_s14 + $0x158] sm:$0xf0]  ;;  %v2024_v38 = vor.u32 %v2228_v29, %v2023_v28  ;;  %v1900_v10 = vor.u32 %v2194_v30, %v1897_v32  ;;  %v2192_v41 = vld [vmem:[%s2665_s14 + $0x34] sm:$0xf0] }
 0x150   : > { %1302 = vmatmul.bf16.vlgmr.msra.gmra.mxu3 %v2815_v47  ;;  %2334 = vset.pattern.permute.xlu0 %v2519_v2  ;;  %v2226_v35 = vld [vmem:[%s2665_s14 + $0x14c] sm:$0xf]  ;;  %v1879_v39 = vld [vmem:[%s2665_s14 + $0x28] sm:$0xf]  ;;  %v2224_v42 = vld [vmem:[%s2665_s14 + $0x134] sm:$0xf0]  ;;  %vm1369_vm1 = vcmp.eq.s32.totalorder %v1365_v34, %v1367_v40 }
 0x151   : > { %1309 = vmatpush.bf16.msrb.mxu0 %v1960_v48  ;;  %v2007_v13 = vld [vmem:[%s2665_s14 + $0x128] sm:$0xf]  ;;  %v2028_v43 = vor.u32 %v2226_v35, %v2025_v36  ;;  %v2190_v45 = vld [vmem:[%s2665_s14 + $0x2c] sm:$0xf]  ;;  %v1881_v46 = vld [vmem:[%s2665_s14 + $0x38] sm:$0xf0] }
 0x152   : > { %1323 = vmatpush.bf16.msrb.mxu1 %v2088_v1  ;;  %1337 = vmatpush.bf16.msrb.mxu2 %v1964_v5  ;;  %v2520_v48 = vmov 0.0   ;;  %v2222_v49 = vld [vmem:[%s2665_s14 + $0x12c] sm:$0xf]  ;;  %v2009_v50 = vld [vmem:[%s2665_s14 + $0x138] sm:$0xf0]  ;;  %v2008_v0 = vor.u32 %v2224_v42, %v2007_v13  ;;  %v1884_v4 = vor.u32 %v2190_v45, %v1881_v46  ;;  %v1374_v21 = vld [vmem:[#allocation2 + $0x30] sm:$0xff] }
 0x153   : > { %1351 = vmatpush.bf16.msrb.mxu3 %v2092_v52  ;;  %v2109_v1 = vsel %vm1368_vm0, 1.0, %v2520_v48  ;;  %v2110_v5 = vsel %vm1369_vm1, 1.0, %v2520_v48  ;;  %v1880_v52 = vor.u32 %v2192_v41, %v1879_v39  ;;  %v1863_v53 = vld [vmem:[%s2665_s14 + $0x8] sm:$0xf]  ;;  %v2188_v54 = vld [vmem:[%s2665_s14 + $0x14] sm:$0xf0] }
 0x154   : > { %v2335_v51 = vpack.i.bf16 %v2110_v5, %v2109_v1  ;;  %v1991_v55 = vld [vmem:[%s2665_s14 + $0x108] sm:$0xf]  ;;  %v1865_v59 = vld [vmem:[%s2665_s14 + $0x18] sm:$0xf0]  ;;  %v2218_v60 = vld [vmem:[%s2665_s14 + $0x10c] sm:$0xf] }
 0x155   : > { %1310 = vmatpush.bf16.msrb.mxu0 %v1944_v56  ;;  %v2012_v56 = vor.u32 %v2222_v49, %v2009_v50  ;;  %v1993_v61 = vld [vmem:[%s2665_s14 + $0x118] sm:$0xf0]  ;;  %v1375_v2 = vld [vmem:[#allocation2] sm:$0xff]  ;;  %v1378_v24 = vld [vmem:[#allocation2 + $0x8] sm:$0xff] }
 0x156   : > { %1324 = vmatpush.bf16.msrb.mxu1 %v2072_v57  ;;  %1338 = vmatpush.bf16.msrb.mxu2 %v1948_v58  ;;  %v2220_v57 = vld [vmem:[%s2665_s14 + $0x114] sm:$0xf0]  ;;  %v2186_v58 = vld [vmem:[%s2665_s14 + $0xc] sm:$0xf]  ;;  %v1996_v9 = vor.u32 %v2218_v60, %v1993_v61  ;;  %v1379_v30 = vld [vmem:[#allocation2 + $0x20] sm:$0xff] }
 0x157   : > { %1352 = vmatpush.bf16.msrb.mxu3 %v2076_v62  ;;  %2336 = vperm.xlu0 %2334, %v2335_v51   ;;  %v1864_v62 = vor.u32 %v2188_v54, %v1863_v53  ;;  %v1992_v63 = vor.u32 %v2220_v57, %v1991_v55  ;;  %v1868_v8 = vor.u32 %v2186_v58, %v1865_v59  ;;  %v1376_v36 = vld [vmem:[#allocation2 + $0x18] sm:$0xff]  ;;  %v1377_v42 = vld [vmem:[#allocation2 + $0x10] sm:$0xff]  ;;  %v1380_v46 = vld [vmem:[#allocation2 + $0x28] sm:$0xff] }
 0x159   : > { %1311 = vmatpush.bf16.msrb.mxu0 %v1928_v14 }
 0x15a   : > { %1325 = vmatpush.bf16.msrb.mxu1 %v2056_v17  ;;  %1339 = vmatpush.bf16.msrb.mxu2 %v1932_v18 }
 0x15b   : > { %1353 = vmatpush.bf16.msrb.mxu3 %v2060_v7 }
 0x15d   : > { %1312 = vmatpush.bf16.msrb.mxu0 %v1912_v23 }
 0x15e   : > { %1326 = vmatpush.bf16.msrb.mxu1 %v2040_v26  ;;  %1340 = vmatpush.bf16.msrb.mxu2 %v1916_v27 }
 0x15f   : > { %1354 = vmatpush.bf16.msrb.mxu3 %v2044_v31 }
 0x161   : > { %1313 = vmatpush.bf16.msrb.mxu0 %v1896_v37 }
 0x162   : > { %1327 = vmatpush.bf16.msrb.mxu1 %v2024_v38  ;;  %1341 = vmatpush.bf16.msrb.mxu2 %v1900_v10 }
 0x163   : > { %1355 = vmatpush.bf16.msrb.mxu3 %v2028_v43 }
 0x165   : > { %1314 = vmatpush.bf16.msrb.mxu0 %v1880_v52  ;;  %v1381_v52 = vld [vmem:[#allocation2 + $0x38] sm:$0xff] }
 0x166   : > { %1328 = vmatpush.bf16.msrb.mxu1 %v2008_v0  ;;  %1342 = vmatpush.bf16.msrb.mxu2 %v1884_v4 }
 0x167   : > { %1356 = vmatpush.bf16.msrb.mxu3 %v2012_v56 }
 0x169   : > { %1315 = vmatpush.bf16.msrb.mxu0 %v1864_v62 }
 0x16a   : > { %1329 = vmatpush.bf16.msrb.mxu1 %v1992_v63  ;;  %1343 = vmatpush.bf16.msrb.mxu2 %v1868_v8 }
 0x16b   : > { %1357 = vmatpush.bf16.msrb.mxu3 %v1996_v9 }
 0x16c   : > { %1316 = vmatmul.bf16.vlgmr.msrb.gmra.mxu0 %v2809_v44 }
 0x16d   : > { %1330 = vmatmul.bf16.vlgmr.msrb.gmra.mxu1 %v2815_v47  ;;  %1344 = vmatmul.bf16.vlgmr.msrb.gmra.mxu2 %v2809_v44 }
 0x16e   : > { %1358 = vmatmul.bf16.vlgmr.msrb.gmra.mxu3 %v2815_v47 }
 0x1c9   : > { %v1261_v11 = vpop.f32.mrf.mxu0  ;;  %v2337_v18 = vpop.permute.xlu0 %2336 }
 0x1ca   : > { %v2339_v3 = vunpack.i.h.bf16 %v2337_v18  ;;  %v2338_v7 = vunpack.i.l.bf16 %v2337_v18 }
 0x1cc   : > { %v1275_v12 = vpop.f32.mrf.mxu1 }
 0x1cd   : > { %v1276_v16 = vadd.f32 %v1275_v12, %v1261_v11 }
 0x1cf   : > { %v1392_v22 = vmul.f32 %v2338_v7, %v1276_v16 }
 0x1d0   : > { %v1289_v14 = vpop.f32.mrf.mxu2 }
 0x1d1   : > { %v1263_v19 = vpop.f32.mrf.mxu0  ;;  %v1400_v25 = vadd.f32 %v1392_v22, %v1374_v21 }
 0x1d3   : > { %v1303_v15 = vpop.f32.mrf.mxu3  ;;  %1408 = vst [vmem:[#allocation2 + $0x30] sm:$0xff] %v1400_v25 }
 0x1d4   : > { %v1304_v17 = vadd.f32 %v1303_v15, %v1289_v14  ;;  %v1277_v20 = vpop.f32.mrf.mxu1 }
 0x1d5   : > { %v1278_v6 = vadd.f32 %v1277_v20, %v1263_v19 }
 0x1d6   : > { %v1393_v23 = vmul.f32 %v2338_v7, %v1304_v17 }
 0x1d7   : > { %v1396_v44 = vmul.f32 %v2339_v3, %v1278_v6 }
 0x1d8   : > { %v1401_v47 = vadd.f32 %v1393_v23, %v1375_v2  ;;  %v1291_v26 = vpop.f32.mrf.mxu2 }
 0x1d9   : > { %v1404_v27 = vadd.f32 %v1396_v44, %v1378_v24 }
 0x1da   : > { %1409 = vst [vmem:[#allocation2] sm:$0xff] %v1401_v47 }
 0x1db   : > { %v1305_v28 = vpop.f32.mrf.mxu3  ;;  %1412 = vst [vmem:[#allocation2 + $0x8] sm:$0xff] %v1404_v27 }
 0x1dc   : > { %v1306_v29 = vadd.f32 %v1305_v28, %v1291_v26 }
 0x1de   : > { %v1397_v31 = vmul.f32 %v2339_v3, %v1306_v29 }
 0x1e0   : > { %v1405_v32 = vadd.f32 %v1397_v31, %v1379_v30 }
 0x1e2   : > { %1413 = vst [vmem:[#allocation2 + $0x20] sm:$0xff] %v1405_v32 }
 0x1e9   : > { %v1317_v33 = vpop.f32.mrf.mxu0 }
 0x1ea   : > { %v1331_v34 = vpop.f32.mrf.mxu1 }
 0x1eb   : > { %v1332_v35 = vadd.f32 %v1331_v34, %v1317_v33 }
 0x1ed   : > { %v1394_v37 = vmul.f32 %v2338_v7, %v1332_v35 }
 0x1ef   : > { %v1402_v38 = vadd.f32 %v1394_v37, %v1376_v36 }
 0x1f0   : > { %v1345_v39 = vpop.f32.mrf.mxu2 }
 0x1f1   : > { %1410 = vst [vmem:[#allocation2 + $0x18] sm:$0xff] %v1402_v38  ;;  %v1359_v40 = vpop.f32.mrf.mxu3  ;;  %v1319_v10 = vpop.f32.mrf.mxu0 }
 0x1f2   : > { %v1360_v41 = vadd.f32 %v1359_v40, %v1345_v39  ;;  %v1333_v13 = vpop.f32.mrf.mxu1 }
 0x1f3   : > { %v1334_v43 = vadd.f32 %v1333_v13, %v1319_v10 }
 0x1f4   : > { %v1395_v45 = vmul.f32 %v2338_v7, %v1360_v41 }
 0x1f5   : > { %v1398_v48 = vmul.f32 %v2339_v3, %v1334_v43 }
 0x1f6   : > { %v1403_v1 = vadd.f32 %v1395_v45, %v1377_v42 }
 0x1f7   : > { %v1406_v5 = vadd.f32 %v1398_v48, %v1380_v46 }
 0x1f8   : > { %1411 = vst [vmem:[#allocation2 + $0x10] sm:$0xff] %v1403_v1  ;;  %v1347_v49 = vpop.f32.mrf.mxu2 }
 0x1f9   : > { %1414 = vst [vmem:[#allocation2 + $0x28] sm:$0xff] %v1406_v5  ;;  %v1361_v50 = vpop.f32.mrf.mxu3 }
 0x1fa   : > { %v1362_v51 = vadd.f32 %v1361_v50, %v1347_v49 }
 0x1fc   : > { %v1399_v0 = vmul.f32 %v2339_v3, %v1362_v51 }
 0x1fe   : > { %v1407_v4 = vadd.f32 %v1399_v0, %v1381_v52 }
 0x200   : > { %1415 = vst [vmem:[#allocation2 + $0x38] sm:$0xff] %v1407_v4 }
 0x201 PF: > { %p2111_p5 = scmp.ne.s32.totalorder %s2504_s1, 1 }
 0x203   : > { %1419 = sbr.rel (%p2111_p5) target bundleno = 529 (0x211), region = 56 }
 0x208   : > { %v1420_v53 = vld [vmem:[#allocation2 + $0x30] sm:$0xff]  ;;  %v1421_v54 = vld [vmem:[#allocation2] sm:$0xff]  ;;  %v1422_v55 = vld [vmem:[#allocation2 + $0x18] sm:$0xff] }
 0x209   : > { %1428 = vst [vmem:[#allocation11] sm:$0xff] %v1420_v53  ;;  %v1423_v56 = vld [vmem:[#allocation2 + $0x10] sm:$0xff]  ;;  %v1424_v57 = vld [vmem:[#allocation2 + $0x8] sm:$0xff]  ;;  %v1425_v58 = vld [vmem:[#allocation2 + $0x20] sm:$0xff] }
 0x20a   : > { %1429 = vst [vmem:[#allocation11 + $0x8] sm:$0xff] %v1421_v54  ;;  %v1426_v59 = vld [vmem:[#allocation2 + $0x28] sm:$0xff]  ;;  %v1427_v60 = vld [vmem:[#allocation2 + $0x38] sm:$0xff] }
 0x20b   : > { %1430 = vst [vmem:[#allocation11 + $0x10] sm:$0xff] %v1422_v55 }
 0x20c   : > { %1431 = vst [vmem:[#allocation11 + $0x18] sm:$0xff] %v1423_v56 }
 0x20d   : > { %1432 = vst [vmem:[#allocation11 + $0x20] sm:$0xff] %v1424_v57 }
 0x20e   : > { %1433 = vst [vmem:[#allocation11 + $0x28] sm:$0xff] %v1425_v58 }
 0x20f   : > { %1434 = vst [vmem:[#allocation11 + $0x30] sm:$0xff] %v1426_v59 }
 0x210   : > { %1435 = vst [vmem:[#allocation11 + $0x38] sm:$0xff] %v1427_v60 }
 0x211 PF: > { %s2925_s1 = sadd.s32 4294967295, %s2512_s8   ;;  %s1449_s17 = sshll.u32 %s2912_s6, 4  ;;  %s1450_s17 = int_to_ptr.hbm [resolvable:$true] %s1449_s17 }
 0x212   : > { %p2274_p12 = scmp.eq.s32.totalorder %s2925_s1, 1  ;;  %s2521_s21 = smov [#allocation11]  }
 0x213   : > { %s1447_s22 = sshll.u32 %s2521_s21, 4  ;;  %s2522_s27 = smov 512   ;;  %s1448_s22 = int_to_ptr.vmem [resolvable:$true] %s1447_s22 }
 0x214   : > { %s2523_s11 = smov 32  }
 0x215   : > { %2258 = dma.vmem_to_hbm [thread:$0]  (%p2274_p12), %s1448_s22, 1024, %s1450_s17, [#allocation8], %s2522_s27, %s2522_s27, %s2523_s11  }
 0x216   : > { %2487 = dma.done.wait (%p2274_p12), [#allocation8], 1024  }
 0x217   : > { %2489 = vsyncadd (%p2274_p12), [#allocation8], 4294966272 }
 0x218 PF: > { %s34_s8 = sadd.s32 1, %s2512_s8   ;;  %s2926_s29 = smov %s2496_s0 }
 0x219   : > { %p31_p13 = scmp.ge.s32.totalorder %s34_s8, 4   ;;  %s2927_s0 = smov %s2500_s30 }
 0x21a   : > { %s2928_s30 = smov %s2640_s12  ;;  %s2929_s1 = smov %s2508_s7 }
 0x21b   : > { %s2930_s7 = smov %s2932_s20  ;;  %33 = sbr.rel (!%p31_p13) target bundleno = 14 (0xe), region = 98 }
 0x220   :  { %1466 = vsyncpa [#allocation7], 1 }
 0x221   :  { %1468 = vsyncpa [#allocation7 + $0x1], 1 }
 0x222   :  { %1469 = vsyncpa [#allocation10], 1 }
 0x223   :  { %1471 = vsyncpa [#allocation10 + $0x1], 1 }
 0x224   :  { %1472 = vsyncpa [#allocation8], 1 }
 0x225   :  { %1474 = vsyncpa [#allocation8 + $0x1], 1 }

</bundles_post_ra>
